<compile_context>
chip_gen: v7x
topology: tpu7x:2x2x1
jax: 0.10.0
libtpu: 0.0.40
codegen_flags: <defaults>
</compile_context>

<pallas_src>
import functools

import jax
import jax.numpy as jnp
from jax.experimental import pallas as pl
from jax.experimental.pallas import tpu as pltpu

_VMEM_LIMIT = 48 * 1024 * 1024          # fits v7x (64 MiB) and v5e/v6e (128 MiB)
_FEAT_RESIDENT_BYTES = 4 * 1024 * 1024  # keep XW1 / HW2 resident below this


def _round_up(x, m):
    return ((x + m - 1) // m) * m


def _pad2d(x, rows, cols, dtype=None):
    x = jnp.asarray(x)
    out = jnp.pad(x, ((0, rows - x.shape[0]), (0, cols - x.shape[1])))
    return out.astype(dtype) if dtype is not None else out


def _pick_tile(n_pad, cap):
    """Largest multiple of 128 that divides n_pad and is <= cap."""
    cap = max(128, min(cap, n_pad))
    best, t = 128, 128
    while t <= cap:
        if n_pad % t == 0:
            best = t
        t += 128
    return best


# --------------------------------------------------------------------------
# Stage 0: row-tiled feature transform  XW1 = (D^-1/2 X) @ W1
# --------------------------------------------------------------------------
def _feature_transform_kernel(x_ref, w_ref, o_ref):
    o_ref[...] = jnp.dot(x_ref[...], w_ref[...],
                         preferred_element_type=jnp.float32).astype(o_ref.dtype)


def _feature_transform(x, w, *, tm):
    n_pad, f_in = x.shape
    f_out = w.shape[1]
    return pl.pallas_call(
        _feature_transform_kernel,
        out_shape=jax.ShapeDtypeStruct((n_pad, f_out), jnp.bfloat16),
        grid_spec=pltpu.PrefetchScalarGridSpec(
            num_scalar_prefetch=0,
            grid=(n_pad // tm,),
            in_specs=[pl.BlockSpec((tm, f_in), lambda i: (i, 0)),
                      pl.BlockSpec((f_in, f_out), lambda i: (0, 0))],
            out_specs=pl.BlockSpec((tm, f_out), lambda i: (i, 0)),
        ),
        compiler_params=pltpu.CompilerParams(
            dimension_semantics=("parallel",),
            vmem_limit_bytes=_VMEM_LIMIT),
        cost_estimate=pl.CostEstimate(
            flops=2 * n_pad * f_in * f_out,
            transcendentals=0,
            bytes_accessed=(n_pad * f_in * 4 + f_in * f_out * 4
                            + n_pad * f_out * 2)),
    )(x, w)


# --------------------------------------------------------------------------
# Stage 1: HW2s = D^-1/2 * (leaky_relu(D^-1/2 (A_hat @ XW1) + b1) @ (W2*gate))
# --------------------------------------------------------------------------
def _propagate1_kernel(a_ref, xw_ref, d_ref, b1_ref, w2_ref, o_ref, acc_ref,
                       *, negative_slope, tk, feat_resident):
    k = pl.program_id(1)

    @pl.when(k == 0)
    def _():
        acc_ref[...] = jnp.zeros_like(acc_ref)

    if feat_resident:
        start = pl.multiple_of(k * tk, tk)
        xw = xw_ref[pl.ds(start, tk), :]
    else:
        xw = xw_ref[...]
    acc_ref[...] += jnp.dot(a_ref[...], xw, preferred_element_type=jnp.float32)

    @pl.when(k == pl.num_programs(1) - 1)
    def _():
        d = d_ref[...]                                   # (tm, 1) f32
        h = d * acc_ref[...] + b1_ref[...]               # conv1 row scale + bias
        h = jnp.where(h >= 0, h, negative_slope * h)     # leaky_relu (f32 VPU)
        hw2 = jnp.dot(h.astype(w2_ref.dtype), w2_ref[...],
                      preferred_element_type=jnp.float32)
        # Pre-apply conv2's column scale (same D^-1/2, row-wise on HW2).
        # d == 0 on padded rows, so padded garbage never reaches stage 2.
        o_ref[...] = (d * hw2).astype(o_ref.dtype)


def _gcn_propagate_1(a, xw1, d_col, b1, w2, *, tm, tk, negative_slope,
                     feat_resident):
    n_pad = a.shape[0]
    hid = xw1.shape[1]
    out = w2.shape[1]
    if feat_resident:
        xw_spec = pl.BlockSpec((n_pad, hid), lambda i, k: (0, 0))
        feat_bytes = n_pad * hid * 2
    else:
        xw_spec = pl.BlockSpec((tk, hid), lambda i, k: (k, 0))
        feat_bytes = (n_pad // tm) * n_pad * hid * 2
    kernel = functools.partial(_propagate1_kernel,
                               negative_slope=negative_slope,
                               tk=tk, feat_resident=feat_resident)
    flops = 2 * n_pad * n_pad * hid + 2 * n_pad * hid * out
    bytes_accessed = (n_pad * n_pad * 2 + feat_bytes + hid * out * 2
                      + n_pad * out * 2 + n_pad * 4)
    return pl.pallas_call(
        kernel,
        out_shape=jax.ShapeDtypeStruct((n_pad, out), jnp.bfloat16),
        grid_spec=pltpu.PrefetchScalarGridSpec(
            num_scalar_prefetch=0,
            grid=(n_pad // tm, n_pad // tk),
            in_specs=[pl.BlockSpec((tm, tk), lambda i, k: (i, k)),
                      xw_spec,
                      pl.BlockSpec((tm, 1), lambda i, k: (i, 0)),
                      pl.BlockSpec((1, hid), lambda i, k: (0, 0)),
                      pl.BlockSpec((hid, out), lambda i, k: (0, 0))],
            out_specs=pl.BlockSpec((tm, out), lambda i, k: (i, 0)),
            scratch_shapes=[pltpu.VMEM((tm, hid), jnp.float32)]),
        compiler_params=pltpu.CompilerParams(
            dimension_semantics=("parallel", "arbitrary"),
            vmem_limit_bytes=_VMEM_LIMIT),
        cost_estimate=pl.CostEstimate(flops=flops, transcendentals=0,
                                      bytes_accessed=bytes_accessed),
    )(a, xw1, d_col, b1, w2)


# --------------------------------------------------------------------------
# Stage 2: out = D^-1/2 (A_hat @ HW2s) + (b2*gate + hyper_bias)
# --------------------------------------------------------------------------
def _propagate2_kernel(a_ref, hw_ref, d_ref, bias_ref, o_ref, acc_ref,
                       *, tk, feat_resident):
    k = pl.program_id(1)

    @pl.when(k == 0)
    def _():
        acc_ref[...] = jnp.zeros_like(acc_ref)

    if feat_resident:
        start = pl.multiple_of(k * tk, tk)
        hw = hw_ref[pl.ds(start, tk), :]
    else:
        hw = hw_ref[...]
    acc_ref[...] += jnp.dot(a_ref[...], hw, preferred_element_type=jnp.float32)

    @pl.when(k == pl.num_programs(1) - 1)
    def _():
        # gate is folded into W2 (stage 1); bias_ref = b2*gate + hyper_bias.
        o_ref[...] = (d_ref[...] * acc_ref[...]
                      + bias_ref[...]).astype(o_ref.dtype)


def _gcn_propagate_2(a, hw2, d_col, bias, *, tm, tk, feat_resident):
    n_pad = a.shape[0]
    out = hw2.shape[1]
    if feat_resident:
        hw_spec = pl.BlockSpec((n_pad, out), lambda i, k: (0, 0))
        feat_bytes = n_pad * out * 2
    else:
        hw_spec = pl.BlockSpec((tk, out), lambda i, k: (k, 0))
        feat_bytes = (n_pad // tm) * n_pad * out * 2
    kernel = functools.partial(_propagate2_kernel, tk=tk,
                               feat_resident=feat_resident)
    flops = 2 * n_pad * n_pad * out
    bytes_accessed = (n_pad * n_pad * 2 + feat_bytes
                      + n_pad * out * 4 + n_pad * 4)
    return pl.pallas_call(
        kernel,
        out_shape=jax.ShapeDtypeStruct((n_pad, out), jnp.float32),
        grid_spec=pltpu.PrefetchScalarGridSpec(
            num_scalar_prefetch=0,
            grid=(n_pad // tm, n_pad // tk),
            in_specs=[pl.BlockSpec((tm, tk), lambda i, k: (i, k)),
                      hw_spec,
                      pl.BlockSpec((tm, 1), lambda i, k: (i, 0)),
                      pl.BlockSpec((1, out), lambda i, k: (0, 0))],
            out_specs=pl.BlockSpec((tm, out), lambda i, k: (i, 0)),
            scratch_shapes=[pltpu.VMEM((tm, out), jnp.float32)]),
        compiler_params=pltpu.CompilerParams(
            dimension_semantics=("parallel", "arbitrary"),
            vmem_limit_bytes=_VMEM_LIMIT),
        cost_estimate=pl.CostEstimate(flops=flops, transcendentals=0,
                                      bytes_accessed=bytes_accessed),
    )(a, hw2, d_col, bias)


# --------------------------------------------------------------------------
# Public wrapper
# --------------------------------------------------------------------------
def concat_squash_gnn(x, edge_index, ctx, params, *, negative_slope=0.2):
    """x: [N, in_dim] f32, edge_index: [2, E] i32 (symmetric), ctx: [1, ctx_dim]."""
    n, in_dim = x.shape
    hidden = params["w1"].shape[1]
    out_dim = params["w2"].shape[1]

    # ---- padded sizes: lane-dense last dims; N padded only to 128 so the
    # O(n_pad^2) adjacency traffic is not inflated by row-tile over-padding.
    n_pad = _round_up(n, 128)
    in_pad = _round_up(in_dim, 128)
    hid_pad = _round_up(hidden, 128)
    out_pad = _round_up(out_dim, 128)

    # ---- A_hat = A + I scattered directly into a pre-padded bf16 buffer.
    # 0/1 entries are exact in bf16; the D^-1/2 normalization stays in f32 and
    # is applied to O(N*F) operands / in kernel epilogues, so no f32 NxN array
    # is ever materialized.
    a_hat = jnp.zeros((n_pad, n_pad), jnp.bfloat16)
    a_hat = a_hat.at[edge_index[0], edge_index[1]].set(
        jnp.ones((edge_index.shape[1],), jnp.bfloat16))
    diag = jnp.arange(n, dtype=jnp.int32)
    a_hat = a_hat.at[diag, diag].set(jnp.ones((n,), jnp.bfloat16))
    deg = jnp.sum(a_hat, axis=1, dtype=jnp.float32)        # exact: 0/1 terms
    d_inv_sqrt = jnp.where(deg > 0.0,
                           1.0 / jnp.sqrt(jnp.maximum(deg, 1.0)), 0.0)
    d_col = d_inv_sqrt.reshape(n_pad, 1)                   # (n_pad, 1) f32

    # ---- hyper gate / bias: tiny ctx matmuls hoisted to plain JAX; gate is
    # folded into W2's columns and the biases are pre-combined so the kernels
    # never stream them separately.
    gate = jax.nn.sigmoid(ctx @ params["wg"] + params["bg"])    # [1, out]
    hyper_bias = ctx @ params["wb"]                             # [1, out]
    w2_gated = params["w2"] * gate                              # [hid, out]
    bias2 = params["b2"] * gate + hyper_bias                    # [1, out]

    # Fold conv1's column scale D^-1/2 into X (O(N*F), cheap, stays f32).
    x_scaled = x.astype(jnp.float32) * d_inv_sqrt[:n, None]

    x_p = _pad2d(x_scaled, n_pad, in_pad)
    w1_p = _pad2d(params["w1"], in_pad, hid_pad)
    b1_p = _pad2d(params["b1"], 1, hid_pad)
    w2_p = _pad2d(w2_gated, hid_pad, out_pad, jnp.bfloat16)
    bias2_p = _pad2d(bias2, 1, out_pad)

    # ---- tiles: divisors of n_pad; >= 2 row tiles when possible so the
    # "parallel" row axis shards across v7x's two TensorCores; large reduction
    # tile (up to 2048) to amortize per-grid-step overhead.
    tm_cap = min(512, n_pad // 2) if n_pad >= 256 else n_pad
    tm = _pick_tile(n_pad, tm_cap)
    tk = _pick_tile(n_pad, 2048)
    feat1_resident = n_pad * hid_pad * 2 <= _FEAT_RESIDENT_BYTES
    feat2_resident = n_pad * out_pad * 2 <= _FEAT_RESIDENT_BYTES

    # Stage 0: XW1 = (D^-1/2 X) @ W1
    xw1 = _feature_transform(x_p, w1_p, tm=tm)
    # Stage 1: HW2s = D^-1/2 * (leaky_relu(D^-1/2 (A_hat @ XW1) + b1) @ (W2*gate))
    hw2 = _gcn_propagate_1(a_hat, xw1, d_col, b1_p, w2_p, tm=tm, tk=tk,
                           negative_slope=negative_slope,
                           feat_resident=feat1_resident)
    # Stage 2: out = D^-1/2 (A_hat @ HW2s) + (b2*gate + hyper_bias)
    y = _gcn_propagate_2(a_hat, hw2, d_col, bias2_p, tm=tm, tk=tk,
                         feat_resident=feat2_resident)
    return y[:n, :out_dim]


# --------------------------------------------------------------------------
# Pure-JAX reference (f32 end-to-end) and parameter init
# --------------------------------------------------------------------------
def _reference(x, edge_index, ctx, params, negative_slope=0.2):
    n = x.shape[0]
    a = jnp.zeros((n, n), jnp.float32).at[edge_index[0], edge_index[1]].set(1.0)
    a_hat = jnp.maximum(a, jnp.eye(n, dtype=jnp.float32))
    d = 1.0 / jnp.sqrt(a_hat.sum(axis=1))
    a_norm = d[:, None] * a_hat * d[None, :]
    h = a_norm @ (x @ params["w1"]) + params["b1"]
    h = jnp.where(h >= 0, h, negative_slope * h)
    y = a_norm @ (h @ params["w2"]) + params["b2"]
    gate = jax.nn.sigmoid(ctx @ params["wg"] + params["bg"])
    hb = ctx @ params["wb"]
    return y * gate + hb


def init_params(key, input_dim, hidden_dim, output_dim, ctx_dim):
    """Deterministic synthetic init (shapes match the nn.Module's parameters)."""
    ks = jax.random.split(key, 7)
    scale = 0.1
    return {
        # GCNConv1: weight [in, hidden], bias [1, hidden]
        "w1": scale * jax.random.normal(ks[0], (input_dim, hidden_dim), jnp.float32),
        "b1": scale * jax.random.normal(ks[1], (1, hidden_dim), jnp.float32),
        # GCNConv2: weight [hidden, out], bias [1, out]
        "w2": scale * jax.random.normal(ks[2], (hidden_dim, output_dim), jnp.float32),
        "b2": scale * jax.random.normal(ks[3], (1, output_dim), jnp.float32),
        # _hyper_gate: Linear(ctx_dim -> out), with bias
        "wg": scale * jax.random.normal(ks[4], (ctx_dim, output_dim), jnp.float32),
        "bg": scale * jax.random.normal(ks[5], (1, output_dim), jnp.float32),
        # _hyper_bias: Linear(ctx_dim -> out), bias=False
        "wb": scale * jax.random.normal(ks[6], (ctx_dim, output_dim), jnp.float32),
    }


if __name__ == "__main__":
    N, INPUT_DIM, HIDDEN_DIM, OUTPUT_DIM, CTX_DIM = 8, 4, 32, 4, 3

    key = jax.random.PRNGKey(0)
    kx, kc, kp = jax.random.split(key, 3)

    x = jax.random.normal(kx, (N, INPUT_DIM), jnp.float32)
    ctx = jax.random.normal(kc, (1, CTX_DIM), jnp.float32)

    # Undirected ring graph: edges in both directions.
    src = jnp.arange(N, dtype=jnp.int32)
    dst = (src + 1) % N
    edge_index = jnp.concatenate(
        [jnp.stack([src, dst], axis=0), jnp.stack([dst, src], axis=0)], axis=1)

    params = init_params(kp, INPUT_DIM, HIDDEN_DIM, OUTPUT_DIM, CTX_DIM)

    out = concat_squash_gnn(x, edge_index, ctx, params, negative_slope=0.2)
    out = jax.block_until_ready(out)

    ref = jax.block_until_ready(_reference(x, edge_index, ctx, params))
    assert out.shape == (N, OUTPUT_DIM), out.shape
    # Tolerance accounts for the bf16 activation / weight streaming (f32 accum,
    # exact 0/1 adjacency, f32 D^-1/2 normalization).
    assert jnp.allclose(out, ref, rtol=2e-2, atol=2e-3), (
        float(jnp.max(jnp.abs(out - ref))))

    print("KERNEL_OK")
</pallas_src>

<mosaic_0001>
module attributes {stable_mosaic.version = 11 : i64} {
  func.func @_feature_transform_kernel(%arg0: i32, %arg1: memref<128x128xf32, #tpu.memory_space<vmem>>, %arg2: memref<128x128xf32, #tpu.memory_space<vmem>>, %arg3: memref<128x128xbf16, #tpu.memory_space<vmem>>) attributes {dimension_semantics = [#tpu.dimension_semantics<parallel>], iteration_bounds = array<i64: 1>, scalar_prefetch = 0 : i64, scratch_operands = 0 : i64, tpu.core_type = #tpu.core_type<tc>, window_params = [{transform_indices = @transform_0, window_bounds = array<i64: 128, 128>}, {pipeline_mode = #tpu.pipeline_mode<synchronous>, transform_indices = @transform_1, window_bounds = array<i64: 128, 128>}, {transform_indices = @transform_2, window_bounds = array<i64: 128, 128>}]} {
    %c0 = arith.constant 0 : index
    %c0_0 = arith.constant 0 : index
    %0 = vector.load %arg1[%c0, %c0_0] : memref<128x128xf32, #tpu.memory_space<vmem>>, vector<128x128xf32>
    %c0_1 = arith.constant 0 : index
    %c0_2 = arith.constant 0 : index
    %1 = vector.load %arg2[%c0_1, %c0_2] : memref<128x128xf32, #tpu.memory_space<vmem>>, vector<128x128xf32>
    %cst = arith.constant dense<0.000000e+00> : vector<128x128xf32>
    %2 = tpu.matmul %0, %1, %cst {dimension_numbers = #tpu.dot_dimension_numbers<[1], [0], [0], [1], [0, 0, 1, 1], [], []>} : vector<128x128xf32>, vector<128x128xf32>, vector<128x128xf32> -> vector<128x128xf32>
    %3 = arith.truncf %2 : vector<128x128xf32> to vector<128x128xbf16>
    %c0_3 = arith.constant 0 : index
    %c0_4 = arith.constant 0 : index
    %4 = vector.load %arg3[%c0_3, %c0_4] : memref<128x128xbf16, #tpu.memory_space<vmem>>, vector<128x128xbf16>
    tpu.vector_store %arg3[%c0_3, %c0_4], %3 {strides = array<i32>} : memref<128x128xbf16, #tpu.memory_space<vmem>>, vector<128x128xbf16>,
    return
  }
  func.func @transform_0(%arg0: i32) -> (i32, i32) {
    %c0_i32 = arith.constant 0 : i32
    %c0_i32_0 = arith.constant 0 : i32
    return %arg0, %c0_i32 : i32, i32
  }
  func.func @transform_1(%arg0: i32) -> (i32, i32) {
    %c0_i32 = arith.constant 0 : i32
    %c0_i32_0 = arith.constant 0 : i32
    %c0_i32_1 = arith.constant 0 : i32
    return %c0_i32, %c0_i32_0 : i32, i32
  }
  func.func @transform_2(%arg0: i32) -> (i32, i32) {
    %c0_i32 = arith.constant 0 : i32
    %c0_i32_0 = arith.constant 0 : i32
    return %arg0, %c0_i32 : i32, i32
  }
}

</mosaic_0001>

<bundles_post_ra>
// kernel: tpu_custom_call.1
= control target key start
LH: loop header
LB: loop body
LE: loop exit
PB: predicated region body
PF: predicated region fallthrough
CT: control target
= control target key end

     0   :  { %7 = vsyncpa [#allocation3], 0  ;;  %s667_s0 = inlined_call_operand.hbm [shape: f32[128,128], index: 0, kind: input, shape index: {}]   ;;  %s668_s1 = inlined_call_operand.hbm [shape: f32[128,128], index: 1, kind: input, shape index: {}]   ;;  %s669_s2 = inlined_call_operand.hbm [shape: bf16[128,128], index: 2, kind: output, shape index: {}]  }
   0x1   :  { %8 = vsyncpa [#allocation6], 0 }
   0x2   :  { %9 = vsyncpa [#allocation4], 0  ;;  %s609_s9 = smov [#allocation2]   ;;  %s537_s13 = scalar_lea.hbm %s667_s0, 2048 }
   0x3   :  { %s15_s10 = sshll.u32 %s609_s9, 4  ;;  %p538_p0 = scmp.ne.s32.totalorder %s667_s0, %s537_s13  ;;  %s16_s10 = int_to_ptr.vmem [resolvable:$true] %s15_s10 }
   0x4   :  { %p541_p1 = scmp.lt.u32.totalorder %s537_s13, %s667_s0 }
   0x6   :  { %p543_p2 = pnand %p541_p1, %p538_p0 }
   0x8   :  { %546 = shalt.err (!%p543_p2)
}
   0x9   :  { %s547_s18 = scalar_lea.vmem %s16_s10, 2048  ;;  %p552_p4 = scmp.lt.s32.totalorder %s16_s10, %s16_s10 }
   0xa   :  { %p548_p3 = scmp.ne.s32.totalorder %s16_s10, %s547_s18  ;;  %p553_p5 = scmp.lt.s32.totalorder %s547_s18, %s547_s18 }
   0xc   :  { %p554_p6 = por %p553_p5, %p552_p4 }
   0xe   :  { %p555_p7 = pnand %p554_p6, %p548_p3 }
  0x10   :  { %558 = shalt.err (!%p555_p7)
}
  0x11   :  { %s610_s19 = smov 128   ;;  %s611_s20 = smov 8  }
  0x12   :  { %21 = dma.hbm_to_vmem [thread:$0]  %s667_s0, 2048, %s16_s10, [#allocation3], %s610_s19, %s610_s19, %s611_s20  }
  0x13   :  { %s612_s23 = smov [#allocation5]   ;;  %s559_s27 = scalar_lea.hbm %s668_s1, 2048 }
  0x14   :  { %s27_s24 = sshll.u32 %s612_s23, 4  ;;  %p560_p8 = scmp.ne.s32.totalorder %s668_s1, %s559_s27  ;;  %s28_s24 = int_to_ptr.vmem [resolvable:$true] %s27_s24 }
  0x15   :  { %p563_p9 = scmp.lt.u32.totalorder %s559_s27, %s668_s1 }
  0x17   :  { %p565_p10 = pnand %p563_p9, %p560_p8 }
  0x19   :  { %568 = shalt.err (!%p565_p10)
}
  0x1a   :  { %s569_s4 = scalar_lea.vmem %s28_s24, 2048  ;;  %p574_p12 = scmp.lt.s32.totalorder %s28_s24, %s28_s24 }
  0x1b   :  { %p570_p11 = scmp.ne.s32.totalorder %s28_s24, %s569_s4  ;;  %p575_p13 = scmp.lt.s32.totalorder %s569_s4, %s569_s4 }
  0x1d   :  { %p576_p0 = por %p575_p13, %p574_p12 }
  0x1f   :  { %p577_p1 = pnand %p576_p0, %p570_p11 }
  0x21   :  { %580 = shalt.err (!%p577_p1)
}
  0x22   :  { %33 = dma.hbm_to_vmem [thread:$0]  %s668_s1, 2048, %s28_s24, [#allocation6], %s610_s19, %s610_s19, %s611_s20  }
  0x23   :  { %603 = dma.done.wait [#allocation3], 2048  }
  0x24   :  { %604 = vsyncadd [#allocation3], 4294965248 }
  0x25   :  { %605 = dma.done.wait [#allocation6], 2048  }
  0x26   :  { %606 = vsyncadd [#allocation6], 4294965248  ;;  %v56_v0 = vld [vmem:[#allocation5] sm:$0xff]  ;;  %v57_v1 = vld [vmem:[#allocation5 + $0x8] sm:$0xff]  ;;  %s613_s1 = smov [#allocation7]  }
  0x27   :  { %v58_v2 = vld [vmem:[#allocation5 + $0x10] sm:$0xff]  ;;  %v482_v3 = vpack.c.bf16 %v57_v1, %v56_v0  ;;  %v59_v4 = vld [vmem:[#allocation5 + $0x18] sm:$0xff]  ;;  %v60_v6 = vld [vmem:[#allocation5 + $0x20] sm:$0xff]  ;;  %s302_s6 = sshll.u32 %s613_s1, 4  ;;  %s303_s6 = int_to_ptr.vmem [resolvable:$true] %s302_s6 }
  0x28   :  { %v486_v5 = vpack.c.bf16 %v59_v4, %v58_v2  ;;  %v61_v7 = vld [vmem:[#allocation5 + $0x28] sm:$0xff]  ;;  %v40_v9 = vld [vmem:[#allocation2] sm:$0xff]  ;;  %v62_v11 = vld [vmem:[#allocation5 + $0x30] sm:$0xff]  ;;  %s581_s7 = scalar_lea.vmem %s303_s6, 1024  ;;  %p586_p3 = scmp.lt.s32.totalorder %s303_s6, %s303_s6 }
  0x29   :  { %483 = vmatprep.subr.bf16.mxu0 %v482_v3  ;;  %514 = vmatprep.subr.bf16.mxu1 %v482_v3  ;;  %v490_v8 = vpack.c.bf16 %v61_v7, %v60_v6  ;;  %v48_v10 = vld [vmem:[#allocation2 + $0x40] sm:$0xff]  ;;  %v63_v12 = vld [vmem:[#allocation5 + $0x38] sm:$0xff]  ;;  %v65_v15 = vld [vmem:[#allocation5 + $0x48] sm:$0xff]  ;;  %p582_p2 = scmp.ne.s32.totalorder %s303_s6, %s581_s7  ;;  %p587_p4 = scmp.lt.s32.totalorder %s581_s7, %s581_s7 }
  0x2a   :  { %485 = vmatpush3.bf16.msra.mxu0 %v482_v3  ;;  %522 = vmatpush3.bf16.msra.mxu1 %v482_v3  ;;  %v494_v13 = vpack.c.bf16 %v63_v12, %v62_v11  ;;  %v64_v14 = vld [vmem:[#allocation5 + $0x40] sm:$0xff]  ;;  %v66_v17 = vld [vmem:[#allocation5 + $0x50] sm:$0xff]  ;;  %v67_v18 = vld [vmem:[#allocation5 + $0x58] sm:$0xff] }
  0x2b   :  { %487 = vmatprep.subr.bf16.mxu0 %v486_v5  ;;  %515 = vmatprep.subr.bf16.mxu1 %v486_v5  ;;  %v498_v16 = vpack.c.bf16 %v65_v15, %v64_v14  ;;  %v502_v19 = vpack.c.bf16 %v67_v18, %v66_v17  ;;  %v68_v20 = vld [vmem:[#allocation5 + $0x60] sm:$0xff]  ;;  %v69_v21 = vld [vmem:[#allocation5 + $0x68] sm:$0xff]  ;;  %v70_v23 = vld [vmem:[#allocation5 + $0x70] sm:$0xff]  ;;  %p588_p5 = por %p587_p4, %p586_p3 }
  0x2c   :  { %458 = vmatprep.mubr.f32.mxu0 %v40_v9  ;;  %470 = vmatprep.mubr.f32.mxu1 %v48_v10  ;;  %v506_v22 = vpack.c.bf16 %v69_v21, %v68_v20  ;;  %v71_v24 = vld [vmem:[#allocation5 + $0x78] sm:$0xff]  ;;  %v41_v26 = vld [vmem:[#allocation2 + $0x8] sm:$0xff]  ;;  %v42_v28 = vld [vmem:[#allocation2 + $0x10] sm:$0xff] }
  0x2d   :  { %v510_v25 = vpack.c.bf16 %v71_v24, %v70_v23  ;;  %v49_v27 = vld [vmem:[#allocation2 + $0x48] sm:$0xff]  ;;  %v50_v29 = vld [vmem:[#allocation2 + $0x50] sm:$0xff]  ;;  %v43_v30 = vld [vmem:[#allocation2 + $0x18] sm:$0xff]  ;;  %p589_p6 = pnand %p588_p5, %p582_p2 }
  0x2e   :  { %489 = vmatpush3.bf16.msra.mxu0 %v486_v5  ;;  %523 = vmatpush3.bf16.msra.mxu1 %v486_v5  ;;  %v51_v31 = vld [vmem:[#allocation2 + $0x58] sm:$0xff]  ;;  %v44_v32 = vld [vmem:[#allocation2 + $0x20] sm:$0xff]  ;;  %v45_v34 = vld [vmem:[#allocation2 + $0x28] sm:$0xff] }
  0x2f   :  { %491 = vmatprep.subr.bf16.mxu0 %v490_v8  ;;  %516 = vmatprep.subr.bf16.mxu1 %v490_v8  ;;  %v52_v33 = vld [vmem:[#allocation2 + $0x60] sm:$0xff]  ;;  %v53_v35 = vld [vmem:[#allocation2 + $0x68] sm:$0xff]  ;;  %v46_v36 = vld [vmem:[#allocation2 + $0x30] sm:$0xff] }
  0x30   :  { %v54_v37 = vld [vmem:[#allocation2 + $0x70] sm:$0xff]  ;;  %v47_v38 = vld [vmem:[#allocation2 + $0x38] sm:$0xff] }
  0x31   :  { %v55_v39 = vld [vmem:[#allocation2 + $0x78] sm:$0xff] }
  0x32   :  { %493 = vmatpush3.bf16.msra.mxu0 %v490_v8  ;;  %524 = vmatpush3.bf16.msra.mxu1 %v490_v8 }
  0x33   :  { %495 = vmatprep.subr.bf16.mxu0 %v494_v13  ;;  %517 = vmatprep.subr.bf16.mxu1 %v494_v13 }
  0x36   :  { %497 = vmatpush3.bf16.msra.mxu0 %v494_v13  ;;  %525 = vmatpush3.bf16.msra.mxu1 %v494_v13 }
  0x37   :  { %499 = vmatprep.subr.bf16.mxu0 %v498_v16  ;;  %518 = vmatprep.subr.bf16.mxu1 %v498_v16 }
  0x3a   :  { %501 = vmatpush3.bf16.msra.mxu0 %v498_v16  ;;  %526 = vmatpush3.bf16.msra.mxu1 %v498_v16 }
  0x3b   :  { %503 = vmatprep.subr.bf16.mxu0 %v502_v19  ;;  %519 = vmatprep.subr.bf16.mxu1 %v502_v19 }
  0x3e   :  { %505 = vmatpush3.bf16.msra.mxu0 %v502_v19  ;;  %527 = vmatpush3.bf16.msra.mxu1 %v502_v19 }
  0x3f   :  { %507 = vmatprep.subr.bf16.mxu0 %v506_v22  ;;  %520 = vmatprep.subr.bf16.mxu1 %v506_v22 }
  0x42   :  { %509 = vmatpush3.bf16.msra.mxu0 %v506_v22  ;;  %528 = vmatpush3.bf16.msra.mxu1 %v506_v22 }
  0x43   :  { %511 = vmatprep.subr.bf16.mxu0 %v510_v25  ;;  %521 = vmatprep.subr.bf16.mxu1 %v510_v25 }
  0x46   :  { %513 = vmatpush3.bf16.msra.mxu0 %v510_v25  ;;  %529 = vmatpush3.bf16.msra.mxu1 %v510_v25 }
  0x49   :  { %459 = vmatmul.mubr.f32.vlgmr.msra.gmra.mrb[0].mxu0 %v41_v26  ;;  %471 = vmatmul.mubr.f32.vlgmr.msra.gmra.mrb[0].mxu1 %v49_v27 }
  0x4a   :  { %461 = vmatprep.mubr.f32.mxu0 %v42_v28  ;;  %473 = vmatprep.mubr.f32.mxu1 %v50_v29 }
  0x4d   :  { %462 = vmatmul.mubr.f32.gmra.mrb[2].mxu0 %v43_v30  ;;  %474 = vmatmul.mubr.f32.gmra.mrb[2].mxu1 %v51_v31 }
  0x4e   :  { %464 = vmatprep.mubr.f32.mxu0 %v44_v32  ;;  %476 = vmatprep.mubr.f32.mxu1 %v52_v33 }
  0x51   :  { %465 = vmatmul.mubr.f32.gmra.mrb[4].mxu0 %v45_v34  ;;  %477 = vmatmul.mubr.f32.gmra.mrb[4].mxu1 %v53_v35 }
  0x52   :  { %467 = vmatprep.mubr.f32.mxu0 %v46_v36  ;;  %479 = vmatprep.mubr.f32.mxu1 %v54_v37 }
  0x55   :  { %468 = vmatmul.mubr.f32.gmra.mrb[6].mxu0 %v47_v38  ;;  %480 = vmatmul.mubr.f32.gmra.mrb[6].mxu1 %v55_v39 }
 0x11c   :  { %v460_v40 = vpop.f32.mrb[0].mxu0  ;;  %v472_v41 = vpop.f32.mrb[0].mxu1 }
 0x11d   :  { %v138_v42 = vpop.f32.mrb[1].mxu0  ;;  %v178_v43 = vpop.f32.mrb[1].mxu1 }
 0x11e   :  { %v350_v44 = vpack.c.bf16 %v460_v40, %v138_v42  ;;  %v370_v45 = vpack.c.bf16 %v472_v41, %v178_v43 }
 0x120   :  { %351 = vst [vmem:[#allocation7] sm:$0xff] %v350_v44   ;;  %390 = vst [vmem:[#allocation7 + $0x20] sm:$0xff] %v370_v45   ;;  %v463_v46 = vpop.f32.mrb[2].mxu0  ;;  %v475_v47 = vpop.f32.mrb[2].mxu1 }
 0x121   :  { %v148_v48 = vpop.f32.mrb[3].mxu0  ;;  %v188_v49 = vpop.f32.mrb[3].mxu1 }
 0x122   :  { %v355_v50 = vpack.c.bf16 %v463_v46, %v148_v48  ;;  %v375_v51 = vpack.c.bf16 %v475_v47, %v188_v49 }
 0x124   :  { %387 = vst [vmem:[#allocation7 + $0x8] sm:$0xff] %v355_v50   ;;  %391 = vst [vmem:[#allocation7 + $0x28] sm:$0xff] %v375_v51   ;;  %v466_v52 = vpop.f32.mrb[4].mxu0  ;;  %v478_v53 = vpop.f32.mrb[4].mxu1 }
 0x125   :  { %v158_v54 = vpop.f32.mrb[5].mxu0  ;;  %v198_v55 = vpop.f32.mrb[5].mxu1 }
 0x126   :  { %v360_v56 = vpack.c.bf16 %v466_v52, %v158_v54  ;;  %v380_v57 = vpack.c.bf16 %v478_v53, %v198_v55 }
 0x128   :  { %388 = vst [vmem:[#allocation7 + $0x10] sm:$0xff] %v360_v56   ;;  %392 = vst [vmem:[#allocation7 + $0x30] sm:$0xff] %v380_v57   ;;  %v469_v58 = vpop.f32.mrb[6].mxu0  ;;  %v481_v59 = vpop.f32.mrb[6].mxu1 }
 0x129   :  { %v168_v60 = vpop.f32.mrb[7].mxu0  ;;  %v208_v61 = vpop.f32.mrb[7].mxu1 }
 0x12a   :  { %v365_v62 = vpack.c.bf16 %v469_v58, %v168_v60  ;;  %v385_v63 = vpack.c.bf16 %v481_v59, %v208_v61 }
 0x12c   :  { %389 = vst [vmem:[#allocation7 + $0x18] sm:$0xff] %v365_v62   ;;  %393 = vst [vmem:[#allocation7 + $0x38] sm:$0xff] %v385_v63  }
 0x12d   :  { %592 = shalt.err (!%p589_p6)
}
 0x12e   :  { %s593_s10 = scalar_lea.hbm %s669_s2, 1024 }
 0x12f   :  { %p594_p7 = scmp.ne.s32.totalorder %s669_s2, %s593_s10  ;;  %p597_p8 = scmp.lt.u32.totalorder %s593_s10, %s669_s2 }
 0x131   :  { %p599_p9 = pnand %p597_p8, %p594_p7 }
 0x133   :  { %602 = shalt.err (!%p599_p9)
}
 0x134   :  { %s614_s15 = smov 64   ;;  %s615_s16 = smov 4  }
 0x135   :  { %308 = dma.vmem_to_hbm [thread:$0]  %s303_s6, 1024, %s669_s2, [#allocation4], %s614_s15, %s614_s15, %s615_s16  }
 0x136   :  { %607 = dma.done.wait [#allocation4], 1024  }
 0x137   :  { %608 = vsyncadd [#allocation4], 4294966272 }
 0x138   :  { %312 = vsyncpa [#allocation3], 1 }
 0x139   :  { %313 = vsyncpa [#allocation6], 1 }
 0x13a   :  { %314 = vsyncpa [#allocation4], 1 }

</bundles_post_ra>
